<compile_context>
chip_gen: v6e
topology: v6e:2x2x1
jax: 0.10.0
libtpu: 0.0.40
codegen_flags: <defaults>
</compile_context>

<pallas_src>
import math
from functools import partial

import jax
import jax.numpy as jnp
import numpy as np
from jax import lax
from jax.experimental import pallas as pl
from jax.experimental.pallas import tpu as pltpu


def _layernorm(x, w, b, eps=1e-12):
    # Matches BSARec's custom LayerNorm (biased variance, eps inside the sqrt).
    u = jnp.mean(x, axis=-1, keepdims=True)
    s = jnp.mean((x - u) ** 2, axis=-1, keepdims=True)
    return w * ((x - u) * lax.rsqrt(s + eps)) + b


def bsarec_layer_kernel(x_ref, mask_ref, lp_ref, wqkv_ref, bqkv_ref, wd_ref, bd_ref,
                        beta_ref, ln1w_ref, ln1b_ref, ln2w_ref, ln2b_ref, o_ref, *,
                        num_heads, head_dim, alpha, bt, seq_len, hidden,
                        compute_dtype, approx_recip):
    f32 = jnp.float32
    cdt = compute_dtype

    x3 = x_ref[...].astype(f32)                        # (bt, S, H)
    x2 = x3.reshape(bt * seq_len, hidden)              # flattened (bt*S, H) slab

    # ---------------- FrequencyLayer (dsp branch) ----------------
    # low = irfft(truncate_c(rfft(x))) as one dense (S, S) operator -> a single
    # batched K=S matmul fills the MXU (no rank-c loop, no concat). f32 operands.
    lp = jnp.broadcast_to(lp_ref[...].astype(f32), (bt, seq_len, seq_len))
    low = jnp.einsum('bst,bth->bsh', lp, x3,
                     preferred_element_type=f32).reshape(bt * seq_len, hidden)
    beta2 = beta_ref[...].astype(f32) ** 2              # sqrt_beta ** 2, (1, H)
    seq_emb_fft = low + beta2 * (x2 - low)               # out_dropout = identity (eval)
    dsp = _layernorm(seq_emb_fft + x2,
                     ln1w_ref[...].astype(f32), ln1b_ref[...].astype(f32))

    # ---------------- MultiHeadAttention (gsp branch) ----------------
    # One merged lane-dense QKV projection; the 1/sqrt(head_dim) softmax scale is
    # already folded into the Q weights/bias host-side.
    qkv = jnp.dot(x2.astype(cdt), wqkv_ref[...],
                  preferred_element_type=f32) + bqkv_ref[...].astype(f32)
    qkv_c = qkv.astype(cdt)                              # single cast, sliced per head
    mask = mask_ref[...].astype(f32)                     # (bt, S, S) additive mask

    def head_slice(block, h):
        off = block * hidden + h * head_dim
        return qkv_c[:, off:off + head_dim].reshape(bt, seq_len, head_dim)

    # TODO(synk): replace with one two-batch-dim einsum when Mosaic support is verified.
    ctx_heads = []
    for h in range(num_heads):                           # short static head loop
        qh, kh, vh = head_slice(0, h), head_slice(1, h), head_slice(2, h)
        s = jnp.einsum('bqd,bkd->bqk', qh, kh, preferred_element_type=f32) + mask
        s = s - jnp.max(s, axis=-1, keepdims=True)
        p = jnp.exp(s)
        p = p * pl.reciprocal(jnp.sum(p, axis=-1, keepdims=True), approx=approx_recip)
        ctx = jnp.einsum('bqk,bkd->bqd', p.astype(cdt), vh,
                         preferred_element_type=f32)     # (bt, S, dh)
        ctx_heads.append(ctx.reshape(bt * seq_len, head_dim))
    ctx_all = jnp.concatenate(ctx_heads, axis=-1) if num_heads > 1 else ctx_heads[0]

    # Single merged output projection: (bt*S, H) @ (H, H).
    attn = jnp.dot(ctx_all.astype(cdt), wd_ref[...],
                   preferred_element_type=f32) + bd_ref[...].astype(f32)
    gsp = _layernorm(attn + x2,
                     ln2w_ref[...].astype(f32), ln2b_ref[...].astype(f32))

    out = alpha * dsp + (1.0 - alpha) * gsp
    o_ref[...] = out.reshape(bt, seq_len, hidden).astype(o_ref.dtype)


def make_lowpass_operator(seq_len, c):
    """Dense (S, S) operator L with L @ x == irfft_ortho(truncate_c(rfft_ortho(x)))."""
    eye = jnp.eye(seq_len, dtype=jnp.float32)
    f = jnp.fft.rfft(eye, axis=0, norm="ortho")
    f = f.at[c:, :].set(0.0)
    return jnp.fft.irfft(f, n=seq_len, axis=0, norm="ortho").astype(jnp.float32)


def _hw_budget():
    """(vmem_limit_bytes, max_rows_per_step) tuned per TPU generation."""
    vmem_cap = 128 * 1024 * 1024
    try:
        vmem_cap = int(getattr(pltpu.get_tpu_info(), "vmem_capacity_bytes", vmem_cap))
    except Exception:
        pass
    if vmem_cap <= 64 * 1024 * 1024:        # v7x-class: 64 MiB per TensorCore
        return 36 * 1024 * 1024, 384
    return 80 * 1024 * 1024, 1024           # v5e / v6e: 128 MiB VMEM


def _pick_block_batch(batch, seq_len, max_rows):
    """Largest divisor of batch with bt*seq_len <= max_rows, preferring a grid of
    >= 2 steps so the 'parallel' axis can feed both TensorCores (megacore / v7x)."""
    bt = 1
    for d in range(1, batch + 1):
        if batch % d == 0 and d * seq_len <= max_rows:
            bt = d
    if batch // bt < 2:
        for d in range(bt, 0, -1):
            if batch % d == 0 and batch // d >= 2:
                bt = d
                break
    return bt


def bsarec_layer(x, attention_mask, params, *, num_heads, alpha,
                 compute_dtype=jnp.bfloat16, approx_recip=True, block_batch=None):
    B, S, H = x.shape
    assert H % num_heads == 0
    head_dim = H // num_heads
    vmem_limit, max_rows = _hw_budget()
    bt = block_batch if block_batch is not None else _pick_block_batch(B, S, max_rows)
    assert B % bt == 0

    f32 = jnp.float32
    # Fold the 1/sqrt(head_dim) attention scale into the Q projection (host-side).
    scale = 1.0 / math.sqrt(head_dim)
    wqkv = params["wqkv"].astype(f32)
    wqkv = jnp.concatenate([wqkv[:, :H] * scale, wqkv[:, H:]], axis=1)
    bqkv = params["bqkv"].astype(f32)
    bqkv = jnp.concatenate([bqkv[:, :H] * scale, bqkv[:, H:]], axis=1)
    # MXU weight operands pre-cast to compute_dtype (halves weight DMA on bf16 path).
    wqkv = wqkv.astype(compute_dtype)
    wd = params["wd"].astype(compute_dtype)
    # Low-pass operator stays f32 (K=S contraction is the numerically sensitive one).
    lp = params["lowpass"].astype(f32)
    # Additive mask: drop the singleton head axis, store bf16 (values 0 / -1e4).
    mask = attention_mask.reshape(B, S, S).astype(jnp.bfloat16)

    def const_spec(arr):
        nd = arr.ndim
        return pl.BlockSpec(arr.shape, lambda b, _nd=nd: (0,) * _nd)

    consts = (lp, wqkv, bqkv, wd, params["bd"].astype(f32),
              params["sqrt_beta"].astype(f32),
              params["ln1_w"].astype(f32), params["ln1_b"].astype(f32),
              params["ln2_w"].astype(f32), params["ln2_b"].astype(f32))

    in_specs = [pl.BlockSpec((bt, S, H), lambda b: (b, 0, 0)),
                pl.BlockSpec((bt, S, S), lambda b: (b, 0, 0))]
    in_specs += [const_spec(a) for a in consts]

    kernel = partial(bsarec_layer_kernel, num_heads=num_heads, head_dim=head_dim,
                     alpha=alpha, bt=bt, seq_len=S, hidden=H,
                     compute_dtype=compute_dtype, approx_recip=approx_recip)

    return pl.pallas_call(
        kernel,
        out_shape=jax.ShapeDtypeStruct((B, S, H), x.dtype),
        grid=(B // bt,),
        in_specs=in_specs,
        out_specs=pl.BlockSpec((bt, S, H), lambda b: (b, 0, 0)),
        compiler_params=pltpu.CompilerParams(
            dimension_semantics=("parallel",),
            vmem_limit_bytes=vmem_limit),
    )(x, mask, *consts)


def reference(x, attention_mask, params, *, num_heads, alpha, c):
    """Pure-JAX f32 reference mirroring the PyTorch forward (real FFT ops)."""
    B, S, H = x.shape
    dh = H // num_heads

    def ln(t, w, b, eps=1e-12):
        u = t.mean(-1, keepdims=True)
        s2 = ((t - u) ** 2).mean(-1, keepdims=True)
        return w * ((t - u) / jnp.sqrt(s2 + eps)) + b

    # FrequencyLayer
    f = jnp.fft.rfft(x, axis=1, norm="ortho")
    f = f.at[:, c:, :].set(0.0)
    low = jnp.fft.irfft(f, n=S, axis=1, norm="ortho")
    high = x - low
    seq_emb = low + (params["sqrt_beta"][None] ** 2) * high
    dsp = ln(seq_emb + x, params["ln1_w"], params["ln1_b"])

    # MultiHeadAttention with the merged projection layout used by the kernel.
    qkv = x @ params["wqkv"] + params["bqkv"][0]
    q, k, v = qkv[..., :H], qkv[..., H:2 * H], qkv[..., 2 * H:]
    split = lambda t: t.reshape(B, S, num_heads, dh).transpose(0, 2, 1, 3)
    qh, kh, vh = split(q), split(k), split(v)
    scores = jnp.einsum("bhqd,bhkd->bhqk", qh, kh) / math.sqrt(dh) + attention_mask
    probs = jax.nn.softmax(scores, axis=-1)
    ctx = jnp.einsum("bhqk,bhkd->bhqd", probs, vh).transpose(0, 2, 1, 3).reshape(B, S, H)
    attn = ctx @ params["wd"] + params["bd"]
    gsp = ln(attn + x, params["ln2_w"], params["ln2_b"])

    return alpha * dsp + (1 - alpha) * gsp


if __name__ == "__main__":
    B, S, H = 2, 8, 32
    num_heads = 2
    c_arg = 5
    c = c_arg // 2 + 1          # args.c // 2 + 1
    alpha = 0.3

    key = jax.random.PRNGKey(0)
    ks = jax.random.split(key, 8)

    params = {
        "lowpass": make_lowpass_operator(S, c),
        "wqkv": 0.1 * jax.random.normal(ks[0], (H, 3 * H), jnp.float32),
        "bqkv": 0.1 * jax.random.normal(ks[1], (1, 3 * H), jnp.float32),
        "wd": 0.1 * jax.random.normal(ks[2], (H, H), jnp.float32),
        "bd": 0.1 * jax.random.normal(ks[3], (1, H), jnp.float32),
        "sqrt_beta": jax.random.normal(ks[4], (1, H), jnp.float32),
        "ln1_w": jnp.ones((1, H), jnp.float32),
        "ln1_b": jnp.zeros((1, H), jnp.float32),
        "ln2_w": jnp.ones((1, H), jnp.float32),
        "ln2_b": jnp.zeros((1, H), jnp.float32),
    }

    x = jax.random.normal(ks[5], (B, S, H), jnp.float32)
    causal = jnp.tril(jnp.ones((S, S), jnp.float32))
    attention_mask = jnp.broadcast_to((1.0 - causal) * -10000.0, (B, 1, S, S))

    ref = reference(x, attention_mask, params, num_heads=num_heads, alpha=alpha, c=c)

    # Structural validation: f32 MXU operands + exact reciprocal -> tight check of
    # the fused low-pass operator, folded scale, bf16 mask and merged projections.
    out_f32 = bsarec_layer(x, attention_mask, params, num_heads=num_heads, alpha=alpha,
                           compute_dtype=jnp.float32, approx_recip=False)
    out_f32 = jax.block_until_ready(out_f32)
    assert out_f32.shape == (B, S, H)
    np.testing.assert_allclose(np.asarray(out_f32), np.asarray(ref),
                               atol=5e-4, rtol=5e-4)

    # Production default: bf16 MXU operands, f32 accumulation, approx EUP reciprocal.
    out_prod = bsarec_layer(x, attention_mask, params, num_heads=num_heads, alpha=alpha)
    out_prod = jax.block_until_ready(out_prod)
    np.testing.assert_allclose(np.asarray(out_prod), np.asarray(ref),
                               atol=3e-2, rtol=3e-2)

    print("KERNEL_OK")
</pallas_src>

<mosaic_0001>
module attributes {stable_mosaic.version = 11 : i64} {
  func.func @bsarec_layer_kernel(%arg0: i32, %arg1: memref<1x8x32xf32, #tpu.memory_space<vmem>>, %arg2: memref<1x8x8xbf16, #tpu.memory_space<vmem>>, %arg3: memref<8x8xf32, #tpu.memory_space<vmem>>, %arg4: memref<32x96xf32, #tpu.memory_space<vmem>>, %arg5: memref<1x96xf32, #tpu.memory_space<vmem>>, %arg6: memref<32x32xf32, #tpu.memory_space<vmem>>, %arg7: memref<1x32xf32, #tpu.memory_space<vmem>>, %arg8: memref<1x32xf32, #tpu.memory_space<vmem>>, %arg9: memref<1x32xf32, #tpu.memory_space<vmem>>, %arg10: memref<1x32xf32, #tpu.memory_space<vmem>>, %arg11: memref<1x32xf32, #tpu.memory_space<vmem>>, %arg12: memref<1x32xf32, #tpu.memory_space<vmem>>, %arg13: memref<1x8x32xf32, #tpu.memory_space<vmem>>) attributes {dimension_semantics = [#tpu.dimension_semantics<parallel>], iteration_bounds = array<i64: 2>, scalar_prefetch = 0 : i64, scratch_operands = 0 : i64, tpu.core_type = #tpu.core_type<tc>, window_params = [{transform_indices = @transform_0, window_bounds = array<i64: 1, 8, 32>}, {transform_indices = @transform_1, window_bounds = array<i64: 1, 8, 8>}, {pipeline_mode = #tpu.pipeline_mode<synchronous>, transform_indices = @transform_2, window_bounds = array<i64: 8, 8>}, {pipeline_mode = #tpu.pipeline_mode<synchronous>, transform_indices = @transform_3, window_bounds = array<i64: 32, 96>}, {pipeline_mode = #tpu.pipeline_mode<synchronous>, transform_indices = @transform_4, window_bounds = array<i64: 1, 96>}, {pipeline_mode = #tpu.pipeline_mode<synchronous>, transform_indices = @transform_5, window_bounds = array<i64: 32, 32>}, {pipeline_mode = #tpu.pipeline_mode<synchronous>, transform_indices = @transform_6, window_bounds = array<i64: 1, 32>}, {pipeline_mode = #tpu.pipeline_mode<synchronous>, transform_indices = @transform_7, window_bounds = array<i64: 1, 32>}, {pipeline_mode = #tpu.pipeline_mode<synchronous>, transform_indices = @transform_8, window_bounds = array<i64: 1, 32>}, {pipeline_mode = #tpu.pipeline_mode<synchronous>, transform_indices = @transform_9, window_bounds = array<i64: 1, 32>}, {pipeline_mode = #tpu.pipeline_mode<synchronous>, transform_indices = @transform_10, window_bounds = array<i64: 1, 32>}, {pipeline_mode = #tpu.pipeline_mode<synchronous>, transform_indices = @transform_11, window_bounds = array<i64: 1, 32>}, {transform_indices = @transform_12, window_bounds = array<i64: 1, 8, 32>}]} {
    %c0 = arith.constant 0 : index
    %c0_0 = arith.constant 0 : index
    %c0_1 = arith.constant 0 : index
    %0 = vector.load %arg1[%c0, %c0_0, %c0_1] : memref<1x8x32xf32, #tpu.memory_space<vmem>>, vector<1x8x32xf32>
    %1 = vector.shape_cast %0 : vector<1x8x32xf32> to vector<8x32xf32>
    %c0_2 = arith.constant 0 : index
    %c0_3 = arith.constant 0 : index
    %2 = vector.load %arg3[%c0_2, %c0_3] : memref<8x8xf32, #tpu.memory_space<vmem>>, vector<8x8xf32>
    %3 = vector.shape_cast %2 : vector<8x8xf32> to vector<1x8x8xf32>
    "tpu.trace_start"() <{level = 10 : i32, message = "bst,bth->bsh"}> : () -> ()
    %cst = arith.constant dense<0.000000e+00> : vector<1x8x32xf32>
    %4 = tpu.matmul %3, %0, %cst {dimension_numbers = #tpu.dot_dimension_numbers<[2], [1], [1], [2], [0, 0, 0, 1, 1, 2], [0], [0]>} : vector<1x8x8xf32>, vector<1x8x32xf32>, vector<1x8x32xf32> -> vector<1x8x32xf32>
    "tpu.trace_stop"() : () -> ()
    %5 = vector.shape_cast %4 : vector<1x8x32xf32> to vector<8x32xf32>
    %c0_4 = arith.constant 0 : index
    %c0_5 = arith.constant 0 : index
    %6 = vector.load %arg8[%c0_4, %c0_5] : memref<1x32xf32, #tpu.memory_space<vmem>>, vector<1x32xf32>
    %7 = arith.mulf %6, %6 : vector<1x32xf32>
    %8 = arith.subf %1, %5 : vector<8x32xf32>
    %9 = vector.broadcast %7 : vector<1x32xf32> to vector<8x32xf32>
    %10 = arith.mulf %9, %8 : vector<8x32xf32>
    %11 = arith.addf %5, %10 : vector<8x32xf32>
    %12 = arith.addf %11, %1 : vector<8x32xf32>
    %c0_6 = arith.constant 0 : index
    %c0_7 = arith.constant 0 : index
    %13 = vector.load %arg9[%c0_6, %c0_7] : memref<1x32xf32, #tpu.memory_space<vmem>>, vector<1x32xf32>
    %c0_8 = arith.constant 0 : index
    %c0_9 = arith.constant 0 : index
    %14 = vector.load %arg10[%c0_8, %c0_9] : memref<1x32xf32, #tpu.memory_space<vmem>>, vector<1x32xf32>
    %cst_10 = arith.constant dense<0.000000e+00> : vector<8xf32>
    %15 = vector.multi_reduction <add>, %12, %cst_10 [1] : vector<8x32xf32> to vector<8xf32>
    %16 = vector.shape_cast %15 : vector<8xf32> to vector<8x1xf32>
    %cst_11 = arith.constant 3.200000e+01 : f32
    %17 = vector.broadcast %cst_11 : f32 to vector<8x1xf32>
    %18 = arith.divf %16, %17 : vector<8x1xf32>
    %19 = vector.broadcast %18 : vector<8x1xf32> to vector<8x32xf32>
    %20 = arith.subf %12, %19 : vector<8x32xf32>
    %21 = arith.mulf %20, %20 : vector<8x32xf32>
    %cst_12 = arith.constant dense<0.000000e+00> : vector<8xf32>
    %22 = vector.multi_reduction <add>, %21, %cst_12 [1] : vector<8x32xf32> to vector<8xf32>
    %23 = vector.shape_cast %22 : vector<8xf32> to vector<8x1xf32>
    %cst_13 = arith.constant 3.200000e+01 : f32
    %24 = vector.broadcast %cst_13 : f32 to vector<8x1xf32>
    %25 = arith.divf %23, %24 : vector<8x1xf32>
    %26 = vector.broadcast %18 : vector<8x1xf32> to vector<8x32xf32>
    %27 = arith.subf %12, %26 : vector<8x32xf32>
    %cst_14 = arith.constant 9.99999996E-13 : f32
    %28 = vector.broadcast %cst_14 : f32 to vector<8x1xf32>
    %29 = arith.addf %25, %28 : vector<8x1xf32>
    %30 = math.rsqrt %29 : vector<8x1xf32>
    %31 = vector.broadcast %30 : vector<8x1xf32> to vector<8x32xf32>
    %32 = arith.mulf %27, %31 : vector<8x32xf32>
    %33 = vector.broadcast %13 : vector<1x32xf32> to vector<8x32xf32>
    %34 = arith.mulf %33, %32 : vector<8x32xf32>
    %35 = vector.broadcast %14 : vector<1x32xf32> to vector<8x32xf32>
    %36 = arith.addf %34, %35 : vector<8x32xf32>
    %c0_15 = arith.constant 0 : index
    %c0_16 = arith.constant 0 : index
    %37 = vector.load %arg4[%c0_15, %c0_16] : memref<32x96xf32, #tpu.memory_space<vmem>>, vector<32x96xf32>
    %cst_17 = arith.constant dense<0.000000e+00> : vector<8x96xf32>
    %38 = tpu.matmul %1, %37, %cst_17 {dimension_numbers = #tpu.dot_dimension_numbers<[1], [0], [0], [1], [0, 0, 1, 1], [], []>} : vector<8x32xf32>, vector<32x96xf32>, vector<8x96xf32> -> vector<8x96xf32>
    %c0_18 = arith.constant 0 : index
    %c0_19 = arith.constant 0 : index
    %39 = vector.load %arg5[%c0_18, %c0_19] : memref<1x96xf32, #tpu.memory_space<vmem>>, vector<1x96xf32>
    %40 = vector.broadcast %39 : vector<1x96xf32> to vector<8x96xf32>
    %41 = arith.addf %38, %40 : vector<8x96xf32>
    %c0_20 = arith.constant 0 : index
    %c0_21 = arith.constant 0 : index
    %c0_22 = arith.constant 0 : index
    %42 = vector.load %arg2[%c0_20, %c0_21, %c0_22] : memref<1x8x8xbf16, #tpu.memory_space<vmem>>, vector<1x8x8xbf16>
    %43 = arith.extf %42 : vector<1x8x8xbf16> to vector<1x8x8xf32>
    %44 = vector.extract_strided_slice %41 {offsets = [0, 0], sizes = [8, 16], strides = [1, 1]} : vector<8x96xf32> to vector<8x16xf32>
    %45 = vector.shape_cast %44 : vector<8x16xf32> to vector<1x8x16xf32>
    %46 = vector.extract_strided_slice %41 {offsets = [0, 32], sizes = [8, 16], strides = [1, 1]} : vector<8x96xf32> to vector<8x16xf32>
    %47 = vector.shape_cast %46 : vector<8x16xf32> to vector<1x8x16xf32>
    %48 = vector.extract_strided_slice %41 {offsets = [0, 64], sizes = [8, 16], strides = [1, 1]} : vector<8x96xf32> to vector<8x16xf32>
    %49 = vector.shape_cast %48 : vector<8x16xf32> to vector<1x8x16xf32>
    "tpu.trace_start"() <{level = 10 : i32, message = "bqd,bkd->bqk"}> : () -> ()
    %cst_23 = arith.constant dense<0.000000e+00> : vector<1x8x8xf32>
    %50 = tpu.matmul %45, %47, %cst_23 {dimension_numbers = #tpu.dot_dimension_numbers<[2], [2], [1], [1], [0, 0, 0, 1, 1, 1], [0], [0]>} : vector<1x8x16xf32>, vector<1x8x16xf32>, vector<1x8x8xf32> -> vector<1x8x8xf32>
    "tpu.trace_stop"() : () -> ()
    %51 = arith.addf %50, %43 : vector<1x8x8xf32>
    %cst_24 = arith.constant dense<0xFF800000> : vector<1x8xf32>
    %52 = vector.multi_reduction <maximumf>, %51, %cst_24 [2] : vector<1x8x8xf32> to vector<1x8xf32>
    %53 = vector.shape_cast %52 : vector<1x8xf32> to vector<1x8x1xf32>
    %54 = vector.broadcast %53 : vector<1x8x1xf32> to vector<1x8x8xf32>
    %55 = arith.subf %51, %54 : vector<1x8x8xf32>
    %56 = math.exp %55 : vector<1x8x8xf32>
    %cst_25 = arith.constant dense<0.000000e+00> : vector<1x8xf32>
    %57 = vector.multi_reduction <add>, %56, %cst_25 [2] : vector<1x8x8xf32> to vector<1x8xf32>
    %58 = vector.shape_cast %57 : vector<1x8xf32> to vector<1x8x1xf32>
    %59 = tpu.reciprocal %58 : vector<1x8x1xf32> -> vector<1x8x1xf32>
    %60 = vector.broadcast %59 : vector<1x8x1xf32> to vector<1x8x8xf32>
    %61 = arith.mulf %56, %60 : vector<1x8x8xf32>
    "tpu.trace_start"() <{level = 10 : i32, message = "bqk,bkd->bqd"}> : () -> ()
    %cst_26 = arith.constant dense<0.000000e+00> : vector<1x8x16xf32>
    %62 = tpu.matmul %61, %49, %cst_26 {dimension_numbers = #tpu.dot_dimension_numbers<[2], [1], [1], [2], [0, 0, 0, 1, 1, 2], [0], [0]>} : vector<1x8x8xf32>, vector<1x8x16xf32>, vector<1x8x16xf32> -> vector<1x8x16xf32>
    "tpu.trace_stop"() : () -> ()
    %63 = vector.shape_cast %62 : vector<1x8x16xf32> to vector<8x16xf32>
    %64 = vector.extract_strided_slice %41 {offsets = [0, 16], sizes = [8, 16], strides = [1, 1]} : vector<8x96xf32> to vector<8x16xf32>
    %65 = vector.shape_cast %64 : vector<8x16xf32> to vector<1x8x16xf32>
    %66 = vector.extract_strided_slice %41 {offsets = [0, 48], sizes = [8, 16], strides = [1, 1]} : vector<8x96xf32> to vector<8x16xf32>
    %67 = vector.shape_cast %66 : vector<8x16xf32> to vector<1x8x16xf32>
    %68 = vector.extract_strided_slice %41 {offsets = [0, 80], sizes = [8, 16], strides = [1, 1]} : vector<8x96xf32> to vector<8x16xf32>
    %69 = vector.shape_cast %68 : vector<8x16xf32> to vector<1x8x16xf32>
    "tpu.trace_start"() <{level = 10 : i32, message = "bqd,bkd->bqk"}> : () -> ()
    %cst_27 = arith.constant dense<0.000000e+00> : vector<1x8x8xf32>
    %70 = tpu.matmul %65, %67, %cst_27 {dimension_numbers = #tpu.dot_dimension_numbers<[2], [2], [1], [1], [0, 0, 0, 1, 1, 1], [0], [0]>} : vector<1x8x16xf32>, vector<1x8x16xf32>, vector<1x8x8xf32> -> vector<1x8x8xf32>
    "tpu.trace_stop"() : () -> ()
    %71 = arith.addf %70, %43 : vector<1x8x8xf32>
    %cst_28 = arith.constant dense<0xFF800000> : vector<1x8xf32>
    %72 = vector.multi_reduction <maximumf>, %71, %cst_28 [2] : vector<1x8x8xf32> to vector<1x8xf32>
    %73 = vector.shape_cast %72 : vector<1x8xf32> to vector<1x8x1xf32>
    %74 = vector.broadcast %73 : vector<1x8x1xf32> to vector<1x8x8xf32>
    %75 = arith.subf %71, %74 : vector<1x8x8xf32>
    %76 = math.exp %75 : vector<1x8x8xf32>
    %cst_29 = arith.constant dense<0.000000e+00> : vector<1x8xf32>
    %77 = vector.multi_reduction <add>, %76, %cst_29 [2] : vector<1x8x8xf32> to vector<1x8xf32>
    %78 = vector.shape_cast %77 : vector<1x8xf32> to vector<1x8x1xf32>
    %79 = tpu.reciprocal %78 : vector<1x8x1xf32> -> vector<1x8x1xf32>
    %80 = vector.broadcast %79 : vector<1x8x1xf32> to vector<1x8x8xf32>
    %81 = arith.mulf %76, %80 : vector<1x8x8xf32>
    "tpu.trace_start"() <{level = 10 : i32, message = "bqk,bkd->bqd"}> : () -> ()
    %cst_30 = arith.constant dense<0.000000e+00> : vector<1x8x16xf32>
    %82 = tpu.matmul %81, %69, %cst_30 {dimension_numbers = #tpu.dot_dimension_numbers<[2], [1], [1], [2], [0, 0, 0, 1, 1, 2], [0], [0]>} : vector<1x8x8xf32>, vector<1x8x16xf32>, vector<1x8x16xf32> -> vector<1x8x16xf32>
    "tpu.trace_stop"() : () -> ()
    %83 = vector.shape_cast %82 : vector<1x8x16xf32> to vector<8x16xf32>
    %84 = tpu.concatenate %63, %83 in 1 : vector<8x16xf32>, vector<8x16xf32> -> vector<8x32xf32>
    %c0_31 = arith.constant 0 : index
    %c0_32 = arith.constant 0 : index
    %85 = vector.load %arg6[%c0_31, %c0_32] : memref<32x32xf32, #tpu.memory_space<vmem>>, vector<32x32xf32>
    %cst_33 = arith.constant dense<0.000000e+00> : vector<8x32xf32>
    %86 = tpu.matmul %84, %85, %cst_33 {dimension_numbers = #tpu.dot_dimension_numbers<[1], [0], [0], [1], [0, 0, 1, 1], [], []>} : vector<8x32xf32>, vector<32x32xf32>, vector<8x32xf32> -> vector<8x32xf32>
    %c0_34 = arith.constant 0 : index
    %c0_35 = arith.constant 0 : index
    %87 = vector.load %arg7[%c0_34, %c0_35] : memref<1x32xf32, #tpu.memory_space<vmem>>, vector<1x32xf32>
    %88 = vector.broadcast %87 : vector<1x32xf32> to vector<8x32xf32>
    %89 = arith.addf %86, %88 : vector<8x32xf32>
    %90 = arith.addf %89, %1 : vector<8x32xf32>
    %c0_36 = arith.constant 0 : index
    %c0_37 = arith.constant 0 : index
    %91 = vector.load %arg11[%c0_36, %c0_37] : memref<1x32xf32, #tpu.memory_space<vmem>>, vector<1x32xf32>
    %c0_38 = arith.constant 0 : index
    %c0_39 = arith.constant 0 : index
    %92 = vector.load %arg12[%c0_38, %c0_39] : memref<1x32xf32, #tpu.memory_space<vmem>>, vector<1x32xf32>
    %cst_40 = arith.constant dense<0.000000e+00> : vector<8xf32>
    %93 = vector.multi_reduction <add>, %90, %cst_40 [1] : vector<8x32xf32> to vector<8xf32>
    %94 = vector.shape_cast %93 : vector<8xf32> to vector<8x1xf32>
    %cst_41 = arith.constant 3.200000e+01 : f32
    %95 = vector.broadcast %cst_41 : f32 to vector<8x1xf32>
    %96 = arith.divf %94, %95 : vector<8x1xf32>
    %97 = vector.broadcast %96 : vector<8x1xf32> to vector<8x32xf32>
    %98 = arith.subf %90, %97 : vector<8x32xf32>
    %99 = arith.mulf %98, %98 : vector<8x32xf32>
    %cst_42 = arith.constant dense<0.000000e+00> : vector<8xf32>
    %100 = vector.multi_reduction <add>, %99, %cst_42 [1] : vector<8x32xf32> to vector<8xf32>
    %101 = vector.shape_cast %100 : vector<8xf32> to vector<8x1xf32>
    %cst_43 = arith.constant 3.200000e+01 : f32
    %102 = vector.broadcast %cst_43 : f32 to vector<8x1xf32>
    %103 = arith.divf %101, %102 : vector<8x1xf32>
    %104 = vector.broadcast %96 : vector<8x1xf32> to vector<8x32xf32>
    %105 = arith.subf %90, %104 : vector<8x32xf32>
    %cst_44 = arith.constant 9.99999996E-13 : f32
    %106 = vector.broadcast %cst_44 : f32 to vector<8x1xf32>
    %107 = arith.addf %103, %106 : vector<8x1xf32>
    %108 = math.rsqrt %107 : vector<8x1xf32>
    %109 = vector.broadcast %108 : vector<8x1xf32> to vector<8x32xf32>
    %110 = arith.mulf %105, %109 : vector<8x32xf32>
    %111 = vector.broadcast %91 : vector<1x32xf32> to vector<8x32xf32>
    %112 = arith.mulf %111, %110 : vector<8x32xf32>
    %113 = vector.broadcast %92 : vector<1x32xf32> to vector<8x32xf32>
    %114 = arith.addf %112, %113 : vector<8x32xf32>
    %cst_45 = arith.constant 3.000000e-01 : f32
    %115 = vector.broadcast %cst_45 : f32 to vector<8x32xf32>
    %116 = arith.mulf %115, %36 : vector<8x32xf32>
    %cst_46 = arith.constant 0.699999988 : f32
    %117 = vector.broadcast %cst_46 : f32 to vector<8x32xf32>
    %118 = arith.mulf %117, %114 : vector<8x32xf32>
    %119 = arith.addf %116, %118 : vector<8x32xf32>
    %120 = vector.shape_cast %119 : vector<8x32xf32> to vector<1x8x32xf32>
    %c0_47 = arith.constant 0 : index
    %c0_48 = arith.constant 0 : index
    %c0_49 = arith.constant 0 : index
    %121 = vector.load %arg13[%c0_47, %c0_48, %c0_49] : memref<1x8x32xf32, #tpu.memory_space<vmem>>, vector<1x8x32xf32>
    tpu.vector_store %arg13[%c0_47, %c0_48, %c0_49], %120 {strides = array<i32>} : memref<1x8x32xf32, #tpu.memory_space<vmem>>, vector<1x8x32xf32>,
    return
  }
  func.func @transform_0(%arg0: i32) -> (i32, i32, i32) {
    %c0_i32 = arith.constant 0 : i32
    %c0_i32_0 = arith.constant 0 : i32
    %c0_i32_1 = arith.constant 0 : i32
    return %arg0, %c0_i32, %c0_i32_0 : i32, i32, i32
  }
  func.func @transform_1(%arg0: i32) -> (i32, i32, i32) {
    %c0_i32 = arith.constant 0 : i32
    %c0_i32_0 = arith.constant 0 : i32
    %c0_i32_1 = arith.constant 0 : i32
    return %arg0, %c0_i32, %c0_i32_0 : i32, i32, i32
  }
  func.func @transform_2(%arg0: i32) -> (i32, i32) {
    %c0_i32 = arith.constant 0 : i32
    %c0_i32_0 = arith.constant 0 : i32
    %c0_i32_1 = arith.constant 0 : i32
    return %c0_i32, %c0_i32_0 : i32, i32
  }
  func.func @transform_3(%arg0: i32) -> (i32, i32) {
    %c0_i32 = arith.constant 0 : i32
    %c0_i32_0 = arith.constant 0 : i32
    %c0_i32_1 = arith.constant 0 : i32
    return %c0_i32, %c0_i32_0 : i32, i32
  }
  func.func @transform_4(%arg0: i32) -> (i32, i32) {
    %c0_i32 = arith.constant 0 : i32
    %c0_i32_0 = arith.constant 0 : i32
    %c0_i32_1 = arith.constant 0 : i32
    return %c0_i32, %c0_i32_0 : i32, i32
  }
  func.func @transform_5(%arg0: i32) -> (i32, i32) {
    %c0_i32 = arith.constant 0 : i32
    %c0_i32_0 = arith.constant 0 : i32
    %c0_i32_1 = arith.constant 0 : i32
    return %c0_i32, %c0_i32_0 : i32, i32
  }
  func.func @transform_6(%arg0: i32) -> (i32, i32) {
    %c0_i32 = arith.constant 0 : i32
    %c0_i32_0 = arith.constant 0 : i32
    %c0_i32_1 = arith.constant 0 : i32
    return %c0_i32, %c0_i32_0 : i32, i32
  }
  func.func @transform_7(%arg0: i32) -> (i32, i32) {
    %c0_i32 = arith.constant 0 : i32
    %c0_i32_0 = arith.constant 0 : i32
    %c0_i32_1 = arith.constant 0 : i32
    return %c0_i32, %c0_i32_0 : i32, i32
  }
  func.func @transform_8(%arg0: i32) -> (i32, i32) {
    %c0_i32 = arith.constant 0 : i32
    %c0_i32_0 = arith.constant 0 : i32
    %c0_i32_1 = arith.constant 0 : i32
    return %c0_i32, %c0_i32_0 : i32, i32
  }
  func.func @transform_9(%arg0: i32) -> (i32, i32) {
    %c0_i32 = arith.constant 0 : i32
    %c0_i32_0 = arith.constant 0 : i32
    %c0_i32_1 = arith.constant 0 : i32
    return %c0_i32, %c0_i32_0 : i32, i32
  }
  func.func @transform_10(%arg0: i32) -> (i32, i32) {
    %c0_i32 = arith.constant 0 : i32
    %c0_i32_0 = arith.constant 0 : i32
    %c0_i32_1 = arith.constant 0 : i32
    return %c0_i32, %c0_i32_0 : i32, i32
  }
  func.func @transform_11(%arg0: i32) -> (i32, i32) {
    %c0_i32 = arith.constant 0 : i32
    %c0_i32_0 = arith.constant 0 : i32
    %c0_i32_1 = arith.constant 0 : i32
    return %c0_i32, %c0_i32_0 : i32, i32
  }
  func.func @transform_12(%arg0: i32) -> (i32, i32, i32) {
    %c0_i32 = arith.constant 0 : i32
    %c0_i32_0 = arith.constant 0 : i32
    %c0_i32_1 = arith.constant 0 : i32
    return %arg0, %c0_i32, %c0_i32_0 : i32, i32, i32
  }
}

</mosaic_0001>

<bundles_post_ra>
// kernel: tpu_custom_call.1
= control target key start
LH: loop header
LB: loop body
LE: loop exit
PB: predicated region body
PF: predicated region fallthrough
CT: control target
= control target key end

     0   :  { %s2106_s0 = inlined_call_operand.hbm [shape: f32[2,8,32], index: 0, kind: input, shape index: {}]   ;;  %s2107_s1 = inlined_call_operand.hbm [shape: bf16[2,8,8], index: 1, kind: input, shape index: {}]   ;;  %s2108_s2 = inlined_call_operand.hbm [shape: f32[8,8], index: 2, kind: input, shape index: {}]   ;;  %s2109_s3 = inlined_call_operand.hbm [shape: f32[32,96], index: 3, kind: input, shape index: {}]   ;;  %s2110_s4 = inlined_call_operand.vmem [shape: f32[1,96], index: 4, kind: input, shape index: {}]   ;;  %s2111_s5 = inlined_call_operand.hbm [shape: f32[32,32], index: 5, kind: input, shape index: {}]   ;;  %s2112_s6 = inlined_call_operand.vmem [shape: f32[1,32], index: 6, kind: input, shape index: {}]   ;;  %s2113_s7 = inlined_call_operand.vmem [shape: f32[1,32], index: 7, kind: input, shape index: {}]   ;;  %s2114_s8 = inlined_call_operand.vmem [shape: f32[1,32], index: 8, kind: input, shape index: {}]   ;;  %s2115_s9 = inlined_call_operand.vmem [shape: f32[1,32], index: 9, kind: input, shape index: {}]   ;;  %s2116_s10 = inlined_call_operand.vmem [shape: f32[1,32], index: 10, kind: input, shape index: {}]   ;;  %s2117_s11 = inlined_call_operand.vmem [shape: f32[1,32], index: 11, kind: input, shape index: {}]   ;;  %s2118_s12 = inlined_call_operand.hbm [shape: f32[2,8,32], index: 12, kind: output, shape index: {}]  }
   0x1   :  { %2127 = sst [smem:[#allocation21_spill]] %s2106_s0 }
   0x2   :  { %2128 = sst [smem:[#allocation22_spill]] %s2108_s2 }
   0x3   :  { %2129 = sst [smem:[#allocation23_spill]] %s2109_s3 }
   0x4   :  { %2130 = sst [smem:[#allocation24_spill]] %s2111_s5 }
   0x5   :  { %17 = vsyncpa [#allocation3], 0 }
   0x6   :  { %19 = vsyncpa [#allocation3 + $0x1], 0 }
   0x7   :  { %20 = vsyncpa [#allocation6], 0 }
   0x8   :  { %22 = vsyncpa [#allocation6 + $0x1], 0 }
   0x9   :  { %23 = vsyncpa [#allocation9], 0 }
   0xa   :  { %24 = vsyncpa [#allocation4], 0 }
   0xb   :  { %26 = vsyncpa [#allocation4 + $0x1], 0  ;;  %s1800_s21 = smov 0   ;;  %s1802_s22 = smov 0  }
   0xc   :  { %s1804_s23 = smov 0   ;;  %s1806_s24 = smov 0  }
   0xd LB: > { %2131 = sst [smem:[#allocation17_spill]] %s1713_s23  ;;  %s1821_s25 = sadd.s32 4294967295, %s1717_s24   ;;  %s1717_s24 = sphi %s1806_s24, %s2157_s24   ;;  %s1713_s23 = sphi %s1804_s23, %s2159_s23   ;;  %s1709_s22 = sphi %s1802_s22, %s2161_s22   ;;  %s1705_s21 = sphi %s1800_s21, %s2160_s21  }
   0xe   : > { %s1300_s26 = sadd.s32 4294967294, %s1717_s24   ;;  %p52_p0 = scmp.ne.s32.totalorder %s1709_s22, %s1705_s21 }
   0xf   : > { %p2119_p1 = scmp.eq.s32.totalorder %s1821_s25, 0  ;;  %p318_p3 = scmp.eq.s32.totalorder %s1300_s26, 1 }
  0x10   : > { %p1301_p5 = scmp.ge.s32.totalorder %s1717_s24, 1  ;;  %p325_p7 = scmp.lt.s32.totalorder %s1717_s24, 3 }
  0x11   : > { %p1830_p4 = por %p2119_p1, %p52_p0  ;;  %p1835_p6 = por %p318_p3, %p52_p0 }
  0x12   : > { %p1840_p8 = pnand %p1301_p5, %p325_p7  ;;  %s1719_s30 = smov [#allocation7]  }
  0x13   : > { %s2132_s27 = scalar_select %p1830_p4, 1, 0 }
  0x14   : > { %s2133_s28 = scalar_select %p1835_p6, 1, 0 }
  0x15   : > { %s2135_s29 = scalar_select %p1840_p8, 1, 0 }
  0x16   : > { %2134 = sst [smem:[#allocation18_spill]] %s2133_s28  ;;  %s338_s13 = sshll.u32 %s1719_s30, 4  ;;  %s339_s13 = int_to_ptr.vmem [resolvable:$true] %s338_s13 }
  0x17   : > { %p1421_p10 = pneg %p1840_p8  ;;  %s1720_s14 = smov [#allocation8]  }
  0x18   : > { %s348_s15 = sshll.u32 %s1720_s14, 4  ;;  %s1721_s17 = smov [#allocation10]   ;;  %s349_s15 = int_to_ptr.vmem [resolvable:$true] %s348_s15 }
  0x19   : > { %p1849_p11 = pnand %p1421_p10, %p2119_p1  ;;  %s364_s18 = sshll.u32 %s1721_s17, 4  ;;  %s365_s18 = int_to_ptr.vmem [resolvable:$true] %s364_s18 }
  0x1a   : > { %s1518_s19 = scalar_lea.vmem %s339_s13, 128  ;;  %p1526_p5 = scmp.lt.s32.totalorder %s339_s13, %s339_s13 }
  0x1b   : > { %p1509_p12 = pneg %p1849_p11  ;;  %p1519_p13 = scmp.ne.s32.totalorder %s339_s13, %s1518_s19 }
  0x1c   : > { %p1527_p7 = scmp.lt.s32.totalorder %s1518_s19, %s1518_s19 }
  0x1d   : > { %p1521_p0 = pnand %p1519_p13, %p1509_p12 }
  0x1e   : > { %p1528_p9 = por %p1527_p7, %p1526_p5 }
  0x1f   : > { %p1522_p3 = pneg %p1521_p0 }
  0x21   : > { %p1529_p10 = pnand %p1528_p9, %p1522_p3 }
  0x23   : > { %1532 = shalt.err (!%p1529_p10)
}
  0x24   : > { %s2137_s2 = sld [smem:[#allocation22_spill]]  ;;  %s1544_s30 = scalar_lea.vmem %s349_s15, 512 }
  0x25   : > { %p1545_p1 = scmp.ne.s32.totalorder %s349_s15, %s1544_s30  ;;  %p1552_p13 = scmp.lt.s32.totalorder %s349_s15, %s349_s15 }
  0x26   : > { %p1553_p0 = scmp.lt.s32.totalorder %s1544_s30, %s1544_s30 }
  0x27   : > { %p1547_p2 = pnand %p1545_p1, %p1509_p12 }
  0x28   : > { %p1554_p4 = por %p1553_p0, %p1552_p13 }
  0x29   : > { %p1548_p6 = pneg %p1547_p2 }
  0x2a   : > { %1424 = dma.hbm_to_vmem [thread:$0]  (!%p1849_p11), %s2137_s2, 128, %s339_s13, [#allocation6]  }
  0x2b   : > { %p1555_p8 = pnand %p1554_p4, %p1548_p6 }
  0x2d   : > { %1558 = shalt.err (!%p1555_p8)
}
  0x2e   : > { %s1722_s14 = smov 128   ;;  %s1723_s17 = smov 8  }
  0x2f   : > { %s2138_s3 = sld [smem:[#allocation23_spill]]  ;;  %s1570_s13 = scalar_lea.vmem %s365_s18, 512 }
  0x30   : > { %p1571_p9 = scmp.ne.s32.totalorder %s365_s18, %s1570_s13  ;;  %p1578_p3 = scmp.lt.s32.totalorder %s365_s18, %s365_s18 }
  0x31   : > { %p1579_p5 = scmp.lt.s32.totalorder %s1570_s13, %s1570_s13 }
  0x32   : > { %p1573_p1 = pnand %p1571_p9, %p1509_p12 }
  0x33   : > { %p1580_p4 = por %p1579_p5, %p1578_p3 }
  0x34   : > { %p1574_p2 = pneg %p1573_p1 }
  0x35   : > { %1427 = dma.hbm_to_vmem [thread:$0]  (!%p1849_p11), %s2138_s3, 512, %s349_s15, [#allocation9], %s1722_s14, %s1722_s14, %s1723_s17  }
  0x36   : > { %p1581_p6 = pnand %p1580_p4, %p1574_p2 }
  0x38   : > { %1584 = shalt.err (!%p1581_p6)
}
  0x39   : > { %s2139_s5 = sld [smem:[#allocation24_spill]]  ;;  %s1880_s15 = sadd.s32 1, %s1717_s24  }
  0x3a   : > { %2140 = sst [smem:[#allocation19_spill]] %s1880_s15  ;;  %s36_s19 = ssub.s32 %s1717_s24, %s1880_s15 }
  0x3b   : > { %s39_s16 = sadd.s32 1, %s1713_s23  ;;  %p37_p8 = scmp.eq.s32.totalorder %s36_s19, 0 }
  0x3c   : > { %p46_p12 = scmp.ne.s32.totalorder %s1713_s23, %s1709_s22  ;;  %p47_p7 = scmp.eq.s32.totalorder %s1717_s24, 0 }
  0x3d   : > { %p1445_p10 = scmp.lt.s32.totalorder %s1717_s24, 2  ;;  %p2142_p0 = scmp.eq.s32.totalorder %s1821_s25, 1 }
  0x3e   : > { %s1890_s20 = scalar_select %p37_p8, %s1713_s23, %s39_s16  }
  0x3f   : > { %1430 = dma.hbm_to_vmem [thread:$0]  (!%p1849_p11), %s2139_s5, 512, %s365_s18, [#allocation9], %s1722_s14, %s1722_s14, %s1723_s17  }
  0x40   : > { %2141 = sst [smem:[#allocation20_spill]] %s1890_s20  ;;  %p48_p13 = por %p47_p7, %p46_p12 }
  0x41   : > { %p1894_p9 = por %p2142_p0, %p46_p12  ;;  %s1899_s26 = sand.u32 1, %s1713_s23  }
  0x42   : > { %s1307_s18 = sshll.u32 %s1717_s24, 7  ;;  %s1306_s14 = sshll.u32 %s1899_s26, 3 }
  0x43   : > { %s2143_s13 = scalar_select %p1894_p9, 1, 0 }
  0x44   : > { %s2144_s0 = sld [smem:[#allocation21_spill]]  ;;  %s400_s16 = scalar_lea.vmem [#allocation2], %s1306_s14 }
  0x45   : > { %s407_s2 = sshll.u32 %s400_s16, 4  ;;  %p1908_p11 = pnand %p1445_p10, %p48_p13  ;;  %s408_s2 = int_to_ptr.vmem [resolvable:$true] %s407_s2 }
  0x46   : > { %s397_s20 = scalar_lea.sflag [#allocation3], %s1899_s26 }
  0x47   : > { %p1587_p2 = pneg %p1908_p11 }
  0x4a   : > { %s1906_s19 = scalar_lea.hbm %s2144_s0, %s1307_s18  ;;  %s1590_s17 = scalar_lea.hbm %s2144_s0, 256 }
  0x4b   : > { %s1585_s23 = scalar_lea.hbm %s1906_s19, 128  ;;  %p1591_p4 = scmp.lt.s32.totalorder %s1906_s19, %s2144_s0 }
  0x4c   : > { %p1586_p1 = scmp.ne.s32.totalorder %s1906_s19, %s1585_s23  ;;  %p1592_p6 = scmp.lt.s32.totalorder %s1590_s17, %s1585_s23 }
  0x4e   : > { %p1588_p3 = pnand %p1587_p2, %p1586_p1  ;;  %p1593_p8 = por %p1592_p6, %p1591_p4 }
  0x50   : > { %p1589_p5 = pneg %p1588_p3 }
  0x52   : > { %p1594_p12 = pnand %p1593_p8, %p1589_p5 }
  0x54   : > { %1597 = shalt.err (!%p1594_p12)
}
  0x55   : > { %s1598_s5 = scalar_lea.vmem %s408_s2, 128  ;;  %s1724_s15 = smov [#allocation2]  }
  0x56   : > { %p1599_p7 = scmp.ne.s32.totalorder %s408_s2, %s1598_s5  ;;  %s1603_s28 = sshll.u32 %s1724_s15, 4  ;;  %s1604_s28 = int_to_ptr.vmem [resolvable:$false] %s1603_s28 }
  0x57   : > { %s1605_s18 = scalar_lea.vmem %s1604_s28, 256  ;;  %p1606_p0 = scmp.lt.s32.totalorder %s408_s2, %s1604_s28 }
  0x58   : > { %p1601_p10 = pnand %p1599_p7, %p1587_p2  ;;  %p1607_p1 = scmp.lt.s32.totalorder %s1605_s18, %s1598_s5 }
  0x5a   : > { %p1602_p13 = pneg %p1601_p10  ;;  %p1608_p3 = por %p1607_p1, %p1606_p0 }
  0x5c   : > { %p1609_p9 = pnand %p1608_p3, %p1602_p13 }
  0x5e   : > { %1612 = shalt.err (!%p1609_p9)
}
  0x5f   : > { %1434 = dma.hbm_to_vmem [thread:$0]  (!%p1908_p11), %s1906_s19, 128, %s408_s2, %s397_s20  }
  0x60   : > { %s1308_s23 = sshll.u32 %s1899_s26, 2  ;;  %s1309_s14 = sshll.u32 %s1717_s24, 6 }
  0x61   : > { %s1939_s15 = scalar_lea.hbm %s2107_s1, %s1309_s14  ;;  %s418_s5 = scalar_lea.vmem [#allocation5], %s1308_s23 }
  0x62   : > { %s425_s28 = sshll.u32 %s418_s5, 4  ;;  %s2146_s16 = sand.u32 1, %s1717_s24   ;;  %s426_s28 = int_to_ptr.vmem [resolvable:$true] %s425_s28 }
  0x63   : > { %s415_s18 = scalar_lea.sflag [#allocation6], %s2146_s16  ;;  %s1613_s0 = scalar_lea.hbm %s1939_s15, 64 }
  0x64   : > { %p1614_p9 = scmp.ne.s32.totalorder %s1939_s15, %s1613_s0  ;;  %s1618_s26 = scalar_lea.hbm %s2107_s1, 128 }
  0x65   : > { %p1619_p6 = scmp.lt.s32.totalorder %s1939_s15, %s2107_s1  ;;  %p1620_p8 = scmp.lt.s32.totalorder %s1618_s26, %s1613_s0 }
  0x66   : > { %p1616_p5 = pnand %p1614_p9, %p1587_p2 }
  0x67   : > { %p1621_p12 = por %p1620_p8, %p1619_p6 }
  0x68   : > { %p1617_p4 = pneg %p1616_p5 }
  0x6a   : > { %p1622_p7 = pnand %p1621_p12, %p1617_p4 }
  0x6c   : > { %1625 = shalt.err (!%p1622_p7)
}
  0x6d   : > { %s1626_s23 = scalar_lea.vmem %s426_s28, 64  ;;  %s1725_s17 = smov [#allocation5]  }
  0x6e   : > { %p1627_p10 = scmp.ne.s32.totalorder %s426_s28, %s1626_s23  ;;  %s1631_s30 = sshll.u32 %s1725_s17, 4  ;;  %s1632_s30 = int_to_ptr.vmem [resolvable:$false] %s1631_s30 }
  0x6f   : > { %s1633_s5 = scalar_lea.vmem %s1632_s30, 128  ;;  %p1634_p1 = scmp.lt.s32.totalorder %s426_s28, %s1632_s30 }
  0x70   : > { %p1629_p13 = pnand %p1627_p10, %p1587_p2  ;;  %p1635_p3 = scmp.lt.s32.totalorder %s1633_s5, %s1626_s23 }
  0x72   : > { %p1630_p0 = pneg %p1629_p13  ;;  %p1636_p9 = por %p1635_p3, %p1634_p1 }
  0x74   : > { %p1637_p5 = pnand %p1636_p9, %p1630_p0 }
  0x76   : > { %1640 = shalt.err (!%p1637_p5)
}
  0x77   : > { %1437 = dma.hbm_to_vmem [thread:$0]  (!%p1908_p11), %s1939_s15, 64, %s426_s28, %s415_s18  }
  0x78   : > { %p2147_p4 = scmp.ne.s32.totalorder %s2135_s29, 0 }
  0x79   : > { %s1964_s0 = sand.u32 (!%p2147_p4), 1, %s1709_s22   ;;  %p2148_p2 = scmp.ne.s32.totalorder (!%p2147_p4), %s2132_s27, 0 }
  0x7a   : > { %434 = sbr.rel (%p2147_p4) target bundleno = 2310 (0x906), region = 68  ;;  %s1311_s16 = sshll.u32 (!%p2147_p4), %s1964_s0, 3 }
  0x7b   : > { %s437_s2 = scalar_lea.sflag (!%p2147_p4), [#allocation3], %s1964_s0  ;;  %s440_s20 = scalar_lea.vmem (!%p2147_p4), [#allocation2], %s1311_s16 }
  0x7f   : > { %1684 = dma.done.wait (%p2148_p2), %s437_s2, 128  }
  0x80   : > { %1686 = vsyncadd (%p2148_p2), %s437_s2, 4294967168  ;;  %s445_s3 = sand.u32 1, %s1821_s25   ;;  %s1312_s29 = sshll.u32 %s1964_s0, 2 }
  0x81   : > { %s446_s15 = scalar_lea.sflag [#allocation6], %s445_s3  ;;  %s1976_s28 = scalar_lea.vmem [#allocation5], %s1312_s29 }
  0x82   : > { %1688 = dma.done.wait (%p2148_p2), %s446_s15, 64  }
  0x83   : > { %1690 = vsyncadd (%p2148_p2), %s446_s15, 4294967232  ;;  %p2149_p11 = scmp.eq.s32.totalorder %s1821_s25, 0 }
  0x85   : > { %1692 = dma.done.wait (%p2149_p11), [#allocation6], 128   ;;  %p2150_p6 = pmov %p2149_p11 }
  0x87   : > { %1694 = vsyncadd (%p2150_p6), [#allocation6], 4294967168  ;;  %p2151_p8 = pmov %p2150_p6 }
  0x88   : > { %p2152_p12 = pmov %p2150_p6 }
  0x89   : > { %1696 = dma.done.wait (%p2151_p8), [#allocation9], 1024  }
  0x8a   : > { %1698 = vsyncadd (%p2152_p12), [#allocation9], 4294966272  ;;  %v1726_v0 = vmov 0.0   ;;  %vm1727_vm0 = vmmov 0   ;;  %v629_v1 = vld [vmem:[#allocation8 + $0x18] sm:$0xff]  ;;  %v628_v2 = vld [vmem:[#allocation8 + $0x10] sm:$0xff]  ;;  %v587_v52 = vlaneseq }
  0x8b   : > { %1361 = vmatprep.subr.mxu1 %v1726_v0  ;;  %1369 = vmatprep.mubr.msk.f32.mxu1 %vm1727_vm0, %v1726_v0  ;;  %v1996_v3 = vld [vmem:[%s440_s20] sm:$0xff]  ;;  %vm597_vm1 = vcmask 261120   ;;  %v508_v6 = vld [vmem:[#allocation7] sm:$0xff]  ;;  %vm509_vm2 = vcmask 64512   ;;  %s1728_s26 = smov 64   ;;  %s1729_s19 = smov 96  }
  0x8c   : > { %1356 = vmatprep.subr.mxu0 %v1726_v0  ;;  %1358 = vmatprep.mubr.msk.f32.mxu0 %vm1727_vm0, %v1726_v0  ;;  %v627_v4 = vld [vmem:[#allocation8 + $0x8] sm:$0xff]  ;;  %v626_v5 = vld [vmem:[#allocation8] sm:$0xff]  ;;  %s1730_s14 = smov 80   ;;  %vm715_vm3 = vcmask 130048   ;;  %v710_v15 = vld [vmem:[%s1976_s28] sm:$0xf] }
  0x8d   : > { %1362 = vmatpush3.msra.mxu1 %v629_v1  ;;  %1357 = vmatpush3.msra.mxu0 %v1996_v3  ;;  %v1320_v7 = vld [vmem:[%s2110_s4] ss:$0 sm:$0xff]  ;;  %v711_v16 = vunpack.c.l.bf16 %v710_v15  ;;  %s1731_s23 = smov 112   ;;  %s1732_s17 = smov 48   ;;  %v1050_v46 = vld [vmem:[#allocation10 + $0x18] sm:$0xff]  ;;  %v1049_v47 = vld [vmem:[#allocation10 + $0x10] sm:$0xff] }
  0x8e   : > { %1363 = vmatprep.subr.mxu1 %v1726_v0  ;;  %1372 = vmatprep.subr.mxu0 %v1726_v0  ;;  %v1048_v48 = vld [vmem:[#allocation10 + $0x8] sm:$0xff]  ;;  %v1047_v49 = vld [vmem:[#allocation10] sm:$0xff]  ;;  %s1733_s30 = smov 16   ;;  %v588_v53 = vshrl.u32 %v587_v52, 7  ;;  %s1166_s3 = scalar_lea.sflag [#allocation4], %s1964_s0 }
  0x8f   : > { %1364 = vmatpush3.msra.mxu1 %v628_v2  ;;  %1359 = vmatmul.mubr.msk.f32.vlgmr.msra.gmra.mxu0 %vm509_vm2, %v508_v6  ;;  %v583_v54 = vld [vmem:[%s2113_s7] sm:$0x1]  ;;  %p2153_p10 = scmp.ne.s32.totalorder %s2143_s13, 0 }
  0x90   : > { %1365 = vmatprep.subr.mxu1 %v1726_v0  ;;  %1374 = vmatprep.mubr.msk.f32.mxu0 %vm1727_vm0, %v1726_v0  ;;  %v584_v55 = vmul.f32 %v583_v54, %v583_v54  ;;  %v589_v56 = vsub.s32 0, %v588_v53 }
  0x91   : > { %1366 = vmatpush3.msra.mxu1 %v627_v4  ;;  %v1328_v4 = vld [vmem:[%s2112_s6] ss:$0 sm:$0xff] }
  0x92   : > { %1367 = vmatprep.subr.mxu1 %v1726_v0  ;;  %v590_v58 = vrot.slane %v584_v55, %v589_v56 }
  0x93   : > { %1368 = vmatpush3.msra.mxu1 %v626_v5 }
  0x94   : > { %1370 = vmatmul.mubr.msk.f32.vlgmr.msra.gmra.mxu1 %vm597_vm1, %v1996_v3  ;;  %1392 = vmatprep.subr.mxu1 %v1726_v0 }
  0x95   : > { %1400 = vmatprep.mubr.msk.f32.mxu1 %vm1727_vm0, %v1726_v0  ;;  %1393 = vmatpush3.msra.mxu1 %v1050_v46 }
  0x96   : > { %1394 = vmatprep.subr.mxu1 %v1726_v0 }
  0x97   : > { %1395 = vmatpush3.msra.mxu1 %v1049_v47 }
  0x98   : > { %1396 = vmatprep.subr.mxu1 %v1726_v0 }
  0x99   : > { %1397 = vmatpush3.msra.mxu1 %v1048_v48 }
  0x9a   : > { %1398 = vmatprep.subr.mxu1 %v1726_v0 }
  0x9b   : > { %1399 = vmatpush3.msra.mxu1 %v1047_v49 }
 0x14f   : > { %v2014_v11 = vpop.f32.mrf.mxu0 }
 0x150   : > { %v585_v57 = vsub.f32 %v1996_v3, %v2014_v11 }
 0x151   : > { %v1360_v12 = vpop.f32.mrf.mxu0 }
 0x152   : > { %v592_v59 = vmul.f32 %v590_v58, %v585_v57 }
 0x154   : > { %v706_v8 = vpop.f32.mrf.mxu1  ;;  %v593_v60 = vadd.f32 %v592_v59, %v2014_v11 }
 0x155   : > { %v707_v9 = vadd.f32 %v1320_v7, %v706_v8 }
 0x156   : > { %v1371_v10 = vpop.f32.mrf.mxu1  ;;  %v594_v61 = vadd.f32 %v593_v60, %v1996_v3 }
 0x157   : > { %801 = vrot.lane.b32.xlu1 %v707_v9, %s1728_s26  ;;  %713 = vrot.lane.b32.xlu0 %v707_v9, %s1729_s19 }
 0x158   : > { %v598_v62 = vsel %vm597_vm1, %v594_v61, 0.0 }
 0x15b   : > { %879 = vrot.lane.b32.xlu1 %v707_v9, %s1730_s14 }
 0x1c9   : > { %v714_v13 = vpop.permute.xlu0 %713  ;;  %v802_v14 = vpop.permute.xlu1 %801 }
 0x1ca   : > { %1373 = vmatpush3.xpose.msk.msra.mxu0 %vm715_vm3, %v714_v13 }
 0x1cb   : > { %1377 = vmatprep.subr.mxu0 %v1726_v0 }
 0x1cd   : > { %1375 = vmatmul.mubr.msk.f32.vlgmr.msra.gmra.mxu0 %vm715_vm3, %v707_v9  ;;  %v880_v26 = vpop.permute.xlu1 %879 }
 0x1ce   : > { %1378 = vmatpush3.msra.mxu0 %v802_v14  ;;  %1379 = vmatprep.mubr.msk.f32.mxu0 %vm1727_vm0, %v1726_v0 }
 0x1cf   : > { %1382 = vmatprep.subr.mxu0 %v1726_v0 }
 0x28d   : > { %v786_v17 = vpop.f32.mrf.mxu0 }
 0x28e   : > { %v787_v18 = vadd.f32 %v786_v17, %v711_v16 }
 0x28f   : > { %v1376_v19 = vpop.f32.mrf.mxu0 }
 0x290   : > { %v790_v20 = vsel %vm509_vm2, %v787_v18, -inf }
 0x291   : > { %791 = vmax.xlane.f32.xlu0 %v790_v20 }
 0x31a   : > { %v792_v21 = vpop.xlane.xlu0 %791 }
 0x31b   : > { %v793_v22 = vsub.f32 %v787_v18, %v792_v21 }
 0x31d   : > { %v794_v23 = vmul.f32 1.442695, %v793_v22 }
 0x31f   : > { %1495 = vpow2.f32 %v794_v23 }
 0x32c   : > { %v1496_v24 = vpop.eup %1495 }
 0x32d   : > { %v796_v25 = vsel %vm509_vm2, %v1496_v24, 0.0 }
 0x32e   : > { %797 = vadd.xlane.f32.xlu1 %v796_v25  ;;  %v1318_v25 = vld [vmem:[%s2114_s8] ss:$0 sm:$0xff] }
 0x33f   : > { %877 = vrot.lane.b32.xlu1 %v707_v9, %s1731_s23  ;;  %s1333_s23 = sshll.u32 %s1821_s25, 7  ;;  %s1734_s25 = smov [#allocation11]  }
 0x340   : > { %s1177_s20 = scalar_lea.hbm %s2118_s12, %s1333_s23  ;;  %s1645_s15 = sshll.u32 %s1734_s25, 4  ;;  %s1646_s15 = int_to_ptr.vmem [resolvable:$false] %s1645_s15 }
 0x3b7   : > { %v798_v27 = vpop.xlane.xlu1 %797 }
 0x3b8   : > { %1497 = vrcp.f32 %v798_v27 }
 0x3bb   : > { %v878_v30 = vpop.permute.xlu1 %877 }
 0x3c5   : > { %v1498_v28 = vpop.eup %1497 }
 0x3c6   : > { %v800_v29 = vmul.f32 %v1498_v28, %v1496_v24  ;;  %v1330_v28 = vld [vmem:[%s2116_s10] ss:$0 sm:$0xff] }
 0x3c8   : > { %1380 = vmatmul.mubr.msk.f32.vlgmr.msra.gmra.mxu0 %vm509_vm2, %v800_v29  ;;  %v1319_v29 = vld [vmem:[%s2115_s9] ss:$0 sm:$0xff] }
 0x3c9   : > { %1383 = vmatpush3.xpose.msk.msra.mxu0 %vm715_vm3, %v880_v26  ;;  %1384 = vmatprep.mubr.msk.f32.mxu0 %vm1727_vm0, %v1726_v0 }
 0x3ca   : > { %1387 = vmatprep.subr.mxu0 %v1726_v0 }
 0x3cc   : > { %1385 = vmatmul.mubr.msk.f32.vlgmr.msra.gmra.mxu0 %vm715_vm3, %v878_v30 }
 0x3cd   : > { %1389 = vmatprep.mubr.msk.f32.mxu0 %vm1727_vm0, %v1726_v0 }
 0x488   : > { %v873_v31 = vpop.f32.mrf.mxu0 }
 0x48a   : > { %v1381_v32 = vpop.f32.mrf.mxu0 }
 0x48c   : > { %v951_v33 = vpop.f32.mrf.mxu0 }
 0x48d   : > { %v952_v34 = vadd.f32 %v951_v33, %v711_v16 }
 0x48e   : > { %v1386_v35 = vpop.f32.mrf.mxu0 }
 0x48f   : > { %v955_v36 = vsel %vm509_vm2, %v952_v34, -inf }
 0x490   : > { %956 = vmax.xlane.f32.xlu1 %v955_v36 }
 0x519   : > { %v957_v37 = vpop.xlane.xlu1 %956 }
 0x51a   : > { %v958_v38 = vsub.f32 %v952_v34, %v957_v37 }
 0x51c   : > { %v959_v39 = vmul.f32 1.442695, %v958_v38 }
 0x51e   : > { %1499 = vpow2.f32 %v959_v39 }
 0x52b   : > { %v1500_v40 = vpop.eup %1499 }
 0x52c   : > { %v961_v41 = vsel %vm509_vm2, %v1500_v40, 0.0 }
 0x52d   : > { %962 = vadd.xlane.f32.xlu0 %v961_v41 }
 0x543   : > { %966 = vrot.lane.b32.xlu0 %v707_v9, %s1732_s17  ;;  %s506_s17 = scalar_lea.vmem [#allocation11], %s1311_s16  ;;  %s1647_s16 = scalar_lea.vmem %s1646_s15, 256 }
 0x5b6   : > { %v963_v42 = vpop.xlane.xlu0 %962 }
 0x5b7   : > { %1501 = vrcp.f32 %v963_v42 }
 0x5ba   : > { %v967_v43 = vpop.permute.xlu0 %966 }
 0x5bb   : > { %1388 = vmatpush3.msra.mxu0 %v967_v43 }
 0x5c4   : > { %v1502_v44 = vpop.eup %1501 }
 0x5c5   : > { %v965_v45 = vmul.f32 %v1502_v44, %v1500_v40 }
 0x5c7   : > { %1390 = vmatmul.mubr.msk.f32.vlgmr.msra.gmra.mxu0 %vm509_vm2, %v965_v45 }
 0x687   : > { %v1038_v50 = vpop.f32.mrf.mxu0 }
 0x688   : > { %1043 = vrot.lane.b32.xlu0 %v1038_v50, %s1733_s30  ;;  %s1179_s30 = sshll.u32 %s506_s17, 4  ;;  %s1180_s30 = int_to_ptr.vmem [resolvable:$true] %s1179_s30 }
 0x689   : > { %v1391_v51 = vpop.f32.mrf.mxu0  ;;  %s1641_s29 = scalar_lea.vmem %s1180_s30, 128  ;;  %p1648_p1 = scmp.lt.s32.totalorder %s1180_s30, %s1646_s15 }
 0x68a   : > { %p1642_p7 = scmp.ne.s32.totalorder %s1180_s30, %s1641_s29  ;;  %p1649_p3 = scmp.lt.s32.totalorder %s1647_s16, %s1641_s29 }
 0x68c   : > { %p1643_p13 = pnand %p1642_p7, %p2153_p10  ;;  %p1650_p9 = por %p1649_p3, %p1648_p1 }
 0x68e   : > { %p1644_p0 = pneg %p1643_p13 }
 0x690   : > { %p1651_p5 = pnand %p1650_p9, %p1644_p0 }
 0x6a7   : > { %599 = vadd.xlane.f32.xlu0 %v598_v62 }
 0x6fa   : > { %v1044_v63 = vpop.permute.xlu0 %1043 }
 0x6fb   : > { %v1046_v0 = vsel %vm715_vm3, %v873_v31, %v1044_v63  ;;  %v1331_v31 = vld [vmem:[%s2117_s11] ss:$0 sm:$0xff] }
 0x6fc   : > { %1401 = vmatmul.mubr.msk.f32.vlgmr.msra.gmra.mxu1 %vm597_vm1, %v1046_v0 }
 0x730   : > { %v600_v1 = vpop.xlane.xlu0 %599 }
 0x731   : > { %v602_v2 = vmul.f32 0.03125, %v600_v1 }
 0x733   : > { %v603_v6 = vsub.f32 %v594_v61, %v602_v2 }
 0x735   : > { %v604_v11 = vmul.f32 %v603_v6, %v603_v6 }
 0x737   : > { %v605_v12 = vsel %vm597_vm1, %v604_v11, 0.0 }
 0x7bc   : > { %v1127_v5 = vpop.f32.mrf.mxu1 }
 0x7bd   : > { %v1128_v7 = vadd.f32 %v1328_v4, %v1127_v5 }
 0x7be   : > { %v1402_v8 = vpop.f32.mrf.mxu1 }
 0x7bf   : > { %v1131_v9 = vadd.f32 %v1128_v7, %v1996_v3 }
 0x7c1   : > { %v1134_v10 = vsel %vm597_vm1, %v1131_v9, 0.0 }
 0x7c2   : > { %1135 = vadd.xlane.f32.xlu1 %v1134_v10 }
 0x7c6   : > { %606 = vadd.xlane.f32.xlu1 %v605_v12 }
 0x84b   : > { %v1136_v13 = vpop.xlane.xlu1 %1135 }
 0x84c   : > { %v1137_v14 = vmul.f32 0.03125, %v1136_v13 }
 0x84e   : > { %v1138_v15 = vsub.f32 %v1131_v9, %v1137_v14 }
 0x84f   : > { %v607_v18 = vpop.xlane.xlu1 %606 }
 0x850   : > { %v1139_v16 = vmul.f32 %v1138_v15, %v1138_v15  ;;  %v608_v19 = vmul.f32 0.03125, %v607_v18 }
 0x852   : > { %v1140_v17 = vsel %vm597_vm1, %v1139_v16, 0.0  ;;  %v609_v20 = vadd.f32 1e-12, %v608_v19 }
 0x853   : > { %1141 = vadd.xlane.f32.xlu1 %v1140_v17 }
 0x854   : > { %1503 = vrsqrt.f32 %v609_v20 }
 0x861   : > { %v1504_v23 = vpop.eup %1503 }
 0x862   : > { %v611_v24 = vmul.f32 %v1504_v23, %v603_v6 }
 0x864   : > { %v618_v26 = vmul.f32 %v1318_v25, %v611_v24 }
 0x866   : > { %v625_v33 = vadd.f32 %v1319_v29, %v618_v26 }
 0x868   : > { %v1161_v35 = vmul.f32 0.3, %v625_v33 }
 0x8dc   : > { %v1142_v21 = vpop.xlane.xlu1 %1141 }
 0x8dd   : > { %v1143_v3 = vmul.f32 0.03125, %v1142_v21 }
 0x8df   : > { %v1144_v22 = vadd.f32 1e-12, %v1143_v3 }
 0x8e1   : > { %1505 = vrsqrt.f32 %v1144_v22 }
 0x8ee   : > { %v1506_v27 = vpop.eup %1505 }
 0x8ef   : > { %v1146_v30 = vmul.f32 %v1506_v27, %v1138_v15 }
 0x8f1   : > { %v1153_v32 = vmul.f32 %v1330_v28, %v1146_v30 }
 0x8f3   : > { %v1160_v34 = vadd.f32 %v1331_v31, %v1153_v32 }
 0x8f5   : > { %v1162_v36 = vmul.f32 0.7, %v1160_v34 }
 0x8f7   : > { %v1163_v37 = vadd.f32 %v1162_v36, %v1161_v35 }
 0x8f9   : > { %1164 = vst.msk [vmem:[%s506_s17] sm:$0xff] %vm597_vm1, %v1163_v37 }
 0x8fa   : > { %1654 = shalt.err (!%p1651_p5)
}
 0x8fb   : > { %s1655_s28 = scalar_lea.hbm %s1177_s20, 128  ;;  %s1659_s18 = scalar_lea.hbm %s2118_s12, 256 }
 0x8fc   : > { %p1656_p4 = scmp.ne.s32.totalorder %s1177_s20, %s1655_s28  ;;  %p1660_p6 = scmp.lt.s32.totalorder %s1177_s20, %s2118_s12 }
 0x8fd   : > { %p1661_p8 = scmp.lt.s32.totalorder %s1659_s18, %s1655_s28 }
 0x8fe   : > { %p1657_p2 = pnand %p1656_p4, %p2153_p10 }
 0x8ff   : > { %p1662_p12 = por %p1661_p8, %p1660_p6 }
 0x900   : > { %p1658_p11 = pneg %p1657_p2 }
 0x902   : > { %p1663_p7 = pnand %p1662_p12, %p1658_p11 }
 0x904   : > { %1666 = shalt.err (!%p1663_p7)
}
 0x905   : > { %1419 = dma.vmem_to_hbm [thread:$0]  (%p2153_p10), %s1180_s30, 128, %s1177_s20, %s1166_s3  }
 0x906 PF: > { %s2154_s14 = sld [smem:[#allocation18_spill]]  ;;  %s1191_s23 = sand.u32 1, %s1705_s21  }
 0x907   : > { %p2156_p0 = scmp.ge.s32.totalorder %s1717_s24, 2  ;;  %s1192_s17 = scalar_lea.sflag [#allocation4], %s1191_s23 }
 0x90c   : > { %p2155_p13 = scmp.ne.s32.totalorder %s2154_s14, 0 }
 0x90e   : > { %p1439_p1 = pnand %p2156_p0, %p2155_p13 }
 0x910   : > { %p1440_p3 = pneg %p1439_p1 }
 0x912   : > { %1700 = dma.done.wait (%p1440_p3), %s1192_s17, 128  }
 0x913   : > { %1702 = vsyncadd (%p1440_p3), %s1192_s17, 4294967168  ;;  %s2157_s24 = sld [smem:[#allocation19_spill]]  ;;  %s2160_s21 = smov %s1709_s22 }
 0x914   : > { %s2158_s5 = sld [smem:[#allocation17_spill]] }
 0x915   : > { %s2159_s23 = sld [smem:[#allocation20_spill]] }
 0x919   : > { %p29_p9 = scmp.ge.s32.totalorder %s2157_s24, 4  }
 0x91a   : > { %s2161_s22 = smov %s2158_s5 }
 0x91b   :  { %31 = sbr.rel (!%p29_p9) target bundleno = 13 (0xd), region = 138 }
 0x920   :  { %1197 = vsyncpa [#allocation3], 1 }
 0x921   :  { %1199 = vsyncpa [#allocation3 + $0x1], 1 }
 0x922   :  { %1200 = vsyncpa [#allocation6], 1 }
 0x923   :  { %1202 = vsyncpa [#allocation6 + $0x1], 1 }
 0x924   :  { %1203 = vsyncpa [#allocation9], 1 }
 0x925   :  { %1204 = vsyncpa [#allocation4], 1 }
 0x926   :  { %1206 = vsyncpa [#allocation4 + $0x1], 1 }

</bundles_post_ra>
